<compile_context>
chip_gen: v7x
topology: tpu7x:2x2x1
jax: 0.10.0
libtpu: 0.0.40
codegen_flags: <defaults>
</compile_context>

<pallas_src>
import functools

import jax
import jax.numpy as jnp
from jax.experimental import pallas as pl
from jax.experimental.pallas import tpu as pltpu

LANE = 128
VMEM_LIMIT = 32 * 1024 * 1024  # safe on v5e/v6e/v7x


def _round_up(x, m):
    return ((x + m - 1) // m) * m


def _pick_tile(dim, candidates):
    for c in candidates:
        if dim % c == 0:
            return c
    return dim


def _pad2(a, rows, cols):
    return jnp.pad(a, ((0, rows - a.shape[0]), (0, cols - a.shape[1])))


# --------------------------------------------------------------------------
# Kernel 1: feature transform  XW = x @ W   (bf16 in, f32 acc, bf16 out)
# --------------------------------------------------------------------------
def linear_kernel(x_ref, w_ref, o_ref):
    o_ref[...] = jnp.dot(
        x_ref[...], w_ref[...], preferred_element_type=jnp.float32
    ).astype(o_ref.dtype)


def feature_transform(x_bf16, w_bf16, *, tm):
    n_pad, f_in = x_bf16.shape
    f_out = w_bf16.shape[1]
    return pl.pallas_call(
        linear_kernel,
        out_shape=jax.ShapeDtypeStruct((n_pad, f_out), jnp.bfloat16),
        grid_spec=pltpu.PrefetchScalarGridSpec(
            num_scalar_prefetch=0,
            grid=(n_pad // tm,),
            in_specs=[
                pl.BlockSpec((tm, f_in), lambda i: (i, 0)),
                pl.BlockSpec((f_in, f_out), lambda i: (0, 0)),
            ],
            out_specs=pl.BlockSpec((tm, f_out), lambda i: (i, 0)),
        ),
        compiler_params=pltpu.CompilerParams(
            dimension_semantics=("parallel",),
            vmem_limit_bytes=VMEM_LIMIT,
        ),
    )(x_bf16, w_bf16)


# --------------------------------------------------------------------------
# Kernel 2: aggregation  out = A_hat @ XW + b  (+ optional ReLU)
#   grid = (row tiles [parallel], K tiles [arbitrary, last]), f32 accumulator,
#   block-occupancy mask (scalar prefetch, SMEM) gates the MXU work.
# --------------------------------------------------------------------------
def agg_kernel(mask_ref, a_ref, xw_ref, b_ref, o_ref, acc_ref, *, relu):
    i = pl.program_id(0)
    k = pl.program_id(1)

    @pl.when(k == 0)
    def _():
        acc_ref[...] = jnp.zeros_like(acc_ref)

    @pl.when(mask_ref[i, k] != 0)
    def _():
        acc_ref[...] += jnp.dot(
            a_ref[...], xw_ref[...], preferred_element_type=jnp.float32
        )

    @pl.when(k == pl.num_programs(1) - 1)
    def _():
        out = acc_ref[...] + b_ref[...]
        if relu:
            out = jnp.maximum(out, 0.0)
        o_ref[...] = out.astype(o_ref.dtype)


def aggregate(a_bf16, xw_bf16, b_row, block_mask, *, tm, tk, relu, out_dtype):
    n_pad = a_bf16.shape[0]
    f_out = xw_bf16.shape[1]
    kernel = functools.partial(agg_kernel, relu=relu)
    return pl.pallas_call(
        kernel,
        out_shape=jax.ShapeDtypeStruct((n_pad, f_out), out_dtype),
        grid_spec=pltpu.PrefetchScalarGridSpec(
            num_scalar_prefetch=1,
            grid=(n_pad // tm, n_pad // tk),
            in_specs=[
                pl.BlockSpec((tm, tk), lambda i, k, m: (i, k)),       # A_hat tile
                pl.BlockSpec((tk, f_out), lambda i, k, m: (k, 0)),    # XW K-slice
                pl.BlockSpec((1, f_out), lambda i, k, m: (0, 0)),     # bias row
            ],
            out_specs=pl.BlockSpec((tm, f_out), lambda i, k, m: (i, 0)),
            scratch_shapes=[pltpu.VMEM((tm, f_out), jnp.float32)],
        ),
        compiler_params=pltpu.CompilerParams(
            dimension_semantics=("parallel", "arbitrary"),
            vmem_limit_bytes=VMEM_LIMIT,
        ),
    )(block_mask, a_bf16, xw_bf16, b_row)


# --------------------------------------------------------------------------
# Glue (plain JAX): normalized adjacency, padding, block mask, forward pass.
# --------------------------------------------------------------------------
def build_normalized_adj(edge_index, num_nodes, edge_weight=None):
    """Dense D^-1/2 (A + I) D^-1/2, matching PyG gcn_norm."""
    src = edge_index[0]
    dst = edge_index[1]
    if edge_weight is None:
        edge_weight = jnp.ones(src.shape[0], dtype=jnp.float32)
    loop = jnp.arange(num_nodes, dtype=src.dtype)
    src = jnp.concatenate([src, loop])
    dst = jnp.concatenate([dst, loop])
    w = jnp.concatenate([edge_weight, jnp.ones(num_nodes, dtype=jnp.float32)])
    adj = jnp.zeros((num_nodes, num_nodes), dtype=jnp.float32).at[dst, src].add(w)
    deg = adj.sum(axis=1)
    dinv = jnp.where(deg > 0, jax.lax.rsqrt(deg), 0.0)
    return dinv[:, None] * adj * dinv[None, :]


def _block_mask(a_pad_f32, tm, tk):
    ni, nk = a_pad_f32.shape[0] // tm, a_pad_f32.shape[1] // tk
    blocks = a_pad_f32.reshape(ni, tm, nk, tk)
    return (jnp.abs(blocks) > 0).any(axis=(1, 3)).astype(jnp.int32)


def gcn_forward(x, edge_index, params, edge_weight=None):
    """Eval-mode forward of the GCN module (dropout == identity)."""
    n, f_in = x.shape
    hidden = params["w1"].shape[1]
    out_ch = params["w2"].shape[1]

    a_hat = build_normalized_adj(edge_index, n, edge_weight)

    # Lane-dense padding: node dim to a multiple of 128, feature dims to 128.
    n_pad = _round_up(n, LANE)
    f_in_p = _round_up(f_in, LANE)
    hid_p = _round_up(hidden, LANE)
    out_p = _round_up(out_ch, LANE)

    tm = _pick_tile(n_pad, (256, 128))
    tk = _pick_tile(n_pad, (512, 256, 128))

    a_pad_f32 = _pad2(a_hat, n_pad, n_pad)
    a_pad = a_pad_f32.astype(jnp.bfloat16)
    x_pad = _pad2(x, n_pad, f_in_p).astype(jnp.bfloat16)
    w1 = _pad2(params["w1"], f_in_p, hid_p).astype(jnp.bfloat16)
    w2 = _pad2(params["w2"], hid_p, out_p).astype(jnp.bfloat16)
    b1 = jnp.pad(params["b1"], (0, hid_p - hidden)).reshape(1, hid_p).astype(jnp.float32)
    b2 = jnp.pad(params["b2"], (0, out_p - out_ch)).reshape(1, out_p).astype(jnp.float32)

    mask = _block_mask(a_pad_f32, tm, tk)

    xw1 = feature_transform(x_pad, w1, tm=tm)
    h = aggregate(a_pad, xw1, b1, mask, tm=tm, tk=tk, relu=True,
                  out_dtype=jnp.bfloat16)
    xw2 = feature_transform(h, w2, tm=tm)
    out = aggregate(a_pad, xw2, b2, mask, tm=tm, tk=tk, relu=False,
                    out_dtype=jnp.float32)
    return out[:n, :out_ch]


def init_params(key, in_channels, hidden_channels, out_channels):
    k1, k2 = jax.random.split(key)
    w1 = jax.random.normal(k1, (in_channels, hidden_channels), jnp.float32) \
        * (1.0 / jnp.sqrt(in_channels))
    w2 = jax.random.normal(k2, (hidden_channels, out_channels), jnp.float32) \
        * (1.0 / jnp.sqrt(hidden_channels))
    b1 = jnp.zeros((hidden_channels,), jnp.float32)
    b2 = jnp.zeros((out_channels,), jnp.float32)
    return {"w1": w1, "b1": b1, "w2": w2, "b2": b2}


def _ref_forward(x, a_hat, params):
    """Pure-JAX reference mirroring the kernel's bf16-input / f32-acc numerics."""
    bf = jnp.bfloat16
    a = a_hat.astype(bf)
    xw1 = jnp.dot(x.astype(bf), params["w1"].astype(bf),
                  preferred_element_type=jnp.float32).astype(bf)
    h = jnp.maximum(
        jnp.dot(a, xw1, preferred_element_type=jnp.float32) + params["b1"], 0.0
    ).astype(bf)
    xw2 = jnp.dot(h, params["w2"].astype(bf),
                  preferred_element_type=jnp.float32).astype(bf)
    return jnp.dot(a, xw2, preferred_element_type=jnp.float32) + params["b2"]


if __name__ == "__main__":
    key = jax.random.PRNGKey(0)
    k_x, k_e, k_p = jax.random.split(key, 3)

    num_nodes = 300                       # pads to 384 -> 3x3 grid of 128 tiles
    in_channels, hidden_channels, out_channels = 16, 32, 8
    num_edges = 2000

    x = jax.random.normal(k_x, (num_nodes, in_channels), jnp.float32)
    edge_index = jax.random.randint(k_e, (2, num_edges), 0, num_nodes, jnp.int32)
    params = init_params(k_p, in_channels, hidden_channels, out_channels)

    out = gcn_forward(x, edge_index, params)
    jax.block_until_ready(out)

    a_hat = build_normalized_adj(edge_index, num_nodes)
    ref = _ref_forward(x, a_hat, params)

    assert out.shape == (num_nodes, out_channels)
    assert jnp.allclose(out, ref, atol=1e-2, rtol=1e-2)

    print("KERNEL_OK")
</pallas_src>

<mosaic_0001>
module attributes {stable_mosaic.version = 11 : i64} {
  func.func @linear_kernel(%arg0: i32, %arg1: memref<128x128xbf16, #tpu.memory_space<vmem>>, %arg2: memref<128x128xbf16, #tpu.memory_space<vmem>>, %arg3: memref<128x128xbf16, #tpu.memory_space<vmem>>) attributes {dimension_semantics = [#tpu.dimension_semantics<parallel>], iteration_bounds = array<i64: 3>, scalar_prefetch = 0 : i64, scratch_operands = 0 : i64, tpu.core_type = #tpu.core_type<tc>, window_params = [{transform_indices = @transform_0, window_bounds = array<i64: 128, 128>}, {pipeline_mode = #tpu.pipeline_mode<synchronous>, transform_indices = @transform_1, window_bounds = array<i64: 128, 128>}, {transform_indices = @transform_2, window_bounds = array<i64: 128, 128>}]} {
    %c0 = arith.constant 0 : index
    %c0_0 = arith.constant 0 : index
    %0 = vector.load %arg1[%c0, %c0_0] : memref<128x128xbf16, #tpu.memory_space<vmem>>, vector<128x128xbf16>
    %c0_1 = arith.constant 0 : index
    %c0_2 = arith.constant 0 : index
    %1 = vector.load %arg2[%c0_1, %c0_2] : memref<128x128xbf16, #tpu.memory_space<vmem>>, vector<128x128xbf16>
    %cst = arith.constant dense<0.000000e+00> : vector<128x128xf32>
    %2 = tpu.matmul %0, %1, %cst {dimension_numbers = #tpu.dot_dimension_numbers<[1], [0], [0], [1], [0, 0, 1, 1], [], []>} : vector<128x128xbf16>, vector<128x128xbf16>, vector<128x128xf32> -> vector<128x128xf32>
    %3 = arith.truncf %2 : vector<128x128xf32> to vector<128x128xbf16>
    %c0_3 = arith.constant 0 : index
    %c0_4 = arith.constant 0 : index
    %4 = vector.load %arg3[%c0_3, %c0_4] : memref<128x128xbf16, #tpu.memory_space<vmem>>, vector<128x128xbf16>
    tpu.vector_store %arg3[%c0_3, %c0_4], %3 {strides = array<i32>} : memref<128x128xbf16, #tpu.memory_space<vmem>>, vector<128x128xbf16>,
    return
  }
  func.func @transform_0(%arg0: i32) -> (i32, i32) {
    %c0_i32 = arith.constant 0 : i32
    %c0_i32_0 = arith.constant 0 : i32
    return %arg0, %c0_i32 : i32, i32
  }
  func.func @transform_1(%arg0: i32) -> (i32, i32) {
    %c0_i32 = arith.constant 0 : i32
    %c0_i32_0 = arith.constant 0 : i32
    %c0_i32_1 = arith.constant 0 : i32
    return %c0_i32, %c0_i32_0 : i32, i32
  }
  func.func @transform_2(%arg0: i32) -> (i32, i32) {
    %c0_i32 = arith.constant 0 : i32
    %c0_i32_0 = arith.constant 0 : i32
    return %arg0, %c0_i32 : i32, i32
  }
}

</mosaic_0001>

<bundles_post_ra>
// kernel: tpu_custom_call.1
= control target key start
LH: loop header
LB: loop body
LE: loop exit
PB: predicated region body
PF: predicated region fallthrough
CT: control target
= control target key end

     0   :  { %7 = vsyncpa [#allocation3], 0  ;;  %s1200_s0 = inlined_call_operand.hbm [shape: bf16[384,128], index: 0, kind: input, shape index: {}]   ;;  %s1201_s1 = inlined_call_operand.hbm [shape: bf16[128,128], index: 1, kind: input, shape index: {}]   ;;  %s1202_s2 = inlined_call_operand.hbm [shape: bf16[384,128], index: 2, kind: output, shape index: {}]  }
   0x1   :  { %9 = vsyncpa [#allocation3 + $0x1], 0 }
   0x2   :  { %10 = vsyncpa [#allocation6], 0 }
   0x3   :  { %11 = vsyncpa [#allocation4], 0 }
   0x4   :  { %13 = vsyncpa [#allocation4 + $0x1], 0  ;;  %s988_s9 = smov 0   ;;  %s990_s10 = smov 0  }
   0x5   :  { %s992_s11 = smov 0   ;;  %s994_s12 = smov 0  }
   0x6 LB: > { %s1009_s13 = sadd.s32 4294967295, %s964_s12   ;;  %s582_s14 = sadd.s32 4294967294, %s964_s12   ;;  %s964_s12 = sphi %s994_s12, %s1221_s12   ;;  %s960_s11 = sphi %s992_s11, %s1220_s11   ;;  %s956_s10 = sphi %s990_s10, %s1219_s10   ;;  %s952_s9 = sphi %s988_s9, %s1218_s9  }
   0x7   : > { %p39_p0 = scmp.ne.s32.totalorder %s956_s10, %s952_s9  ;;  %p1203_p1 = scmp.eq.s32.totalorder %s1009_s13, 0 }
   0x8   : > { %p90_p3 = scmp.eq.s32.totalorder %s582_s14, 2  ;;  %p583_p5 = scmp.ge.s32.totalorder %s964_s12, 1 }
   0x9   : > { %p1018_p4 = por %p1203_p1, %p39_p0  ;;  %p97_p7 = scmp.lt.s32.totalorder %s964_s12, 4 }
   0xa   : > { %p1023_p6 = por %p90_p3, %p39_p0  ;;  %s966_s18 = smov [#allocation5]  }
   0xb   : > { %s1206_s15 = scalar_select %p1018_p4, 1, 0 }
   0xc   : > { %s1207_s16 = scalar_select %p1023_p6, 1, 0 }
   0xd   : > { %p1028_p8 = pnand %p583_p5, %p97_p7  ;;  %s109_s19 = sshll.u32 %s966_s18, 4  ;;  %s110_s19 = int_to_ptr.vmem [resolvable:$true] %s109_s19 }
   0xe   : > { %s1041_s21 = sadd.s32 1, %s964_s12   ;;  %s26_s22 = sadd.s32 1, %s960_s11 }
   0xf   : > { %s1208_s17 = scalar_select %p1028_p8, 1, 0 }
  0x10   : > { %p767_p9 = pneg %p1028_p8  ;;  %s23_s23 = ssub.s32 %s964_s12, %s1041_s21 }
  0x11   : > { %s836_s26 = scalar_lea.hbm %s1201_s1, 1024 }
  0x12   : > { %p1036_p10 = pnand %p767_p9, %p1203_p1  ;;  %p837_p11 = scmp.ne.s32.totalorder %s1201_s1, %s836_s26 }
  0x13   : > { %p843_p3 = scmp.lt.u32.totalorder %s836_s26, %s1201_s1 }
  0x14   : > { %p838_p12 = pneg %p1036_p10 }
  0x16   : > { %p839_p13 = pnand %p838_p12, %p837_p11 }
  0x18   : > { %p840_p0 = pneg %p839_p13 }
  0x1a   : > { %p845_p5 = pnand %p843_p3, %p840_p0 }
  0x1c   : > { %848 = shalt.err (!%p845_p5)
}
  0x1d   : > { %s849_s3 = scalar_lea.vmem %s110_s19, 1024  ;;  %p857_p2 = scmp.lt.s32.totalorder %s110_s19, %s110_s19 }
  0x1e   : > { %p850_p7 = scmp.ne.s32.totalorder %s110_s19, %s849_s3  ;;  %p858_p6 = scmp.lt.s32.totalorder %s849_s3, %s849_s3 }
  0x20   : > { %p852_p9 = pnand %p850_p7, %p838_p12  ;;  %p859_p4 = por %p858_p6, %p857_p2 }
  0x22   : > { %p853_p1 = pneg %p852_p9 }
  0x24   : > { %p860_p8 = pnand %p859_p4, %p853_p1 }
  0x26   : > { %863 = shalt.err (!%p860_p8)
}
  0x27   : > { %s967_s4 = smov 64   ;;  %s968_s5 = smov 4  }
  0x28   : > { %770 = dma.hbm_to_vmem [thread:$0]  (!%p1036_p10), %s1201_s1, 1024, %s110_s19, [#allocation6], %s967_s4, %s967_s4, %s968_s5  }
  0x29   : > { %p24_p1 = scmp.eq.s32.totalorder %s23_s23, 0  ;;  %p33_p2 = scmp.ne.s32.totalorder %s960_s11, %s956_s10 }
  0x2a   : > { %p34_p4 = scmp.eq.s32.totalorder %s964_s12, 0  ;;  %p780_p6 = scmp.lt.s32.totalorder %s964_s12, 3 }
  0x2b   : > { %s1070_s8 = scalar_select %p24_p1, %s960_s11, %s26_s22  }
  0x2c   : > { %p35_p8 = por %p34_p4, %p33_p2  ;;  %p1210_p11 = scmp.eq.s32.totalorder %s1009_s13, 2 }
  0x2d   : > { %s123_s18 = sand.u32 1, %s960_s11   ;;  %s630_s20 = sshll.u32 %s964_s12, 10 }
  0x2e   : > { %p1074_p12 = por %p1210_p11, %p33_p2  ;;  %s586_s24 = sshll.u32 %s123_s18, 6 }
  0x2f   : > { %s1083_s27 = scalar_lea.hbm %s1200_s0, %s630_s20  ;;  %s127_s19 = scalar_lea.vmem [#allocation2], %s586_s24 }
  0x30   : > { %s134_s22 = sshll.u32 %s127_s19, 4  ;;  %p1085_p10 = pnand %p780_p6, %p35_p8  ;;  %s1089_s22 = int_to_ptr.vmem [resolvable:$true] %s134_s22 }
  0x31   : > { %s1091_s28 = scalar_lea.sflag [#allocation3], %s123_s18  ;;  %s864_s29 = scalar_lea.hbm %s1083_s27, 1024 }
  0x32   : > { %p865_p13 = scmp.ne.s32.totalorder %s1083_s27, %s864_s29  ;;  %p866_p0 = pneg %p1085_p10 }
  0x33   : > { %s869_s6 = scalar_lea.hbm %s1200_s0, 3072  ;;  %p870_p7 = scmp.lt.u32.totalorder %s1083_s27, %s1200_s0 }
  0x34   : > { %p867_p3 = pnand %p866_p0, %p865_p13  ;;  %p871_p9 = scmp.lt.u32.totalorder %s869_s6, %s864_s29 }
  0x35   : > { %p873_p2 = scmp.lt.u32.totalorder %s864_s29, %s1083_s27 }
  0x36   : > { %p868_p5 = pneg %p867_p3  ;;  %p872_p1 = por %p871_p9, %p870_p7 }
  0x38   : > { %p874_p4 = por %p873_p2, %p872_p1 }
  0x3a   : > { %p875_p6 = pnand %p874_p4, %p868_p5 }
  0x3c   : > { %878 = shalt.err (!%p875_p6)
}
  0x3d   : > { %s879_s18 = scalar_lea.vmem %s1089_s22, 1024  ;;  %s969_s24 = smov [#allocation2]  }
  0x3e   : > { %p880_p8 = scmp.ne.s32.totalorder %s1089_s22, %s879_s18  ;;  %s884_s25 = sshll.u32 %s969_s24, 4  ;;  %s885_s25 = int_to_ptr.vmem [resolvable:$false] %s884_s25 }
  0x3f   : > { %s886_s26 = scalar_lea.vmem %s885_s25, 2048  ;;  %p887_p3 = scmp.lt.s32.totalorder %s1089_s22, %s885_s25 }
  0x40   : > { %p882_p11 = pnand %p880_p8, %p866_p0  ;;  %p888_p7 = scmp.lt.s32.totalorder %s886_s26, %s879_s18 }
  0x42   : > { %p883_p13 = pneg %p882_p11  ;;  %p889_p9 = por %p888_p7, %p887_p3 }
  0x44   : > { %p890_p1 = pnand %p889_p9, %p883_p13 }
  0x46   : > { %893 = shalt.err (!%p890_p1)
}
  0x47   : > { %774 = dma.hbm_to_vmem [thread:$0]  (!%p1085_p10), %s1083_s27, 1024, %s1089_s22, %s1091_s28, %s967_s4, %s967_s4, %s968_s5  }
  0x48   : > { %p1213_p0 = scmp.ne.s32.totalorder %s1208_s17, 0 }
  0x49   : > { %s1125_s19 = sand.u32 (!%p1213_p0), 1, %s956_s10   ;;  %p1214_p5 = scmp.ne.s32.totalorder (!%p1213_p0), %s1206_s15, 0 }
  0x4a   : > { %146 = sbr.rel (%p1213_p0) target bundleno = 358 (0x166), region = 28  ;;  %s590_s29 = sshll.u32 (!%p1213_p0), %s1125_s19, 6 }
  0x4b   : > { %s149_s30 = scalar_lea.sflag (!%p1213_p0), [#allocation3], %s1125_s19  ;;  %s1131_s23 = scalar_lea.vmem (!%p1213_p0), [#allocation2], %s590_s29 }
  0x51   : > { %939 = dma.done.wait (%p1214_p5), %s149_s30, 1024  }
  0x52   : > { %941 = vsyncadd (%p1214_p5), %s149_s30, 4294966272  ;;  %p1215_p10 = scmp.eq.s32.totalorder %s1009_s13, 0 }
  0x54   : > { %943 = dma.done.wait (%p1215_p10), [#allocation6], 1024   ;;  %p1216_p2 = pmov %p1215_p10 }
  0x55   : > { %v820_v0 = vld [vmem:[#allocation5] sm:$0xff]   ;;  %v821_v1 = vld [vmem:[#allocation5 + $0x8] sm:$0xff]   ;;  %v822_v2 = vld [vmem:[#allocation5 + $0x10] sm:$0xff]   ;;  %s176_s15 = scalar_lea.vmem [#allocation7], %s590_s29  ;;  %s647_s4 = sshll.u32 %s1009_s13, 10 }
  0x56   : > { %945 = vsyncadd (%p1216_p2), [#allocation6], 4294966272  ;;  %711 = vmatprep.subr.bf16.mxu0 %v820_v0  ;;  %743 = vmatprep.subr.bf16.mxu1 %v820_v0  ;;  %v823_v3 = vld [vmem:[#allocation5 + $0x18] sm:$0xff]   ;;  %v828_v4 = vld [vmem:[%s1131_s23] sm:$0xff]   ;;  %s499_s17 = sshll.u32 %s176_s15, 4  ;;  %s1157_s22 = scalar_lea.hbm %s1202_s2, %s647_s4  ;;  %s1152_s17 = int_to_ptr.vmem [resolvable:$true] %s499_s17 }
  0x57   : > { %712 = vmatpush3.bf16.msra.mxu0 %v820_v0  ;;  %751 = vmatpush3.bf16.msra.mxu1 %v820_v0  ;;  %v829_v5 = vld [vmem:[%s1131_s23 + $0x20] sm:$0xff]   ;;  %v825_v7 = vld [vmem:[#allocation5 + $0x28] sm:$0xff]   ;;  %v826_v8 = vld [vmem:[#allocation5 + $0x30] sm:$0xff]   ;;  %s486_s13 = scalar_lea.sflag [#allocation4], %s1125_s19  ;;  %s894_s28 = scalar_lea.vmem %s1152_s17, 1024 }
  0x58   : > { %713 = vmatprep.subr.bf16.mxu0 %v821_v1  ;;  %744 = vmatprep.subr.bf16.mxu1 %v821_v1  ;;  %v824_v6 = vld [vmem:[#allocation5 + $0x20] sm:$0xff]   ;;  %v827_v9 = vld [vmem:[#allocation5 + $0x38] sm:$0xff]   ;;  %v830_v10 = vld [vmem:[%s1131_s23 + $0x8] sm:$0xff]   ;;  %p895_p4 = scmp.ne.s32.totalorder %s1152_s17, %s894_s28  ;;  %s970_s3 = smov [#allocation7]  }
  0x59   : > { %727 = vmatprep.mubr.bf16.mxu0 %v828_v4  ;;  %735 = vmatprep.mubr.bf16.mxu1 %v829_v5  ;;  %v831_v11 = vld [vmem:[%s1131_s23 + $0x28] sm:$0xff]   ;;  %v832_v12 = vld [vmem:[%s1131_s23 + $0x10] sm:$0xff]   ;;  %v834_v14 = vld [vmem:[%s1131_s23 + $0x18] sm:$0xff]   ;;  %s898_s6 = sshll.u32 %s970_s3, 4  ;;  %s899_s6 = int_to_ptr.vmem [resolvable:$false] %s898_s6 }
  0x5a   : > { %v833_v13 = vld [vmem:[%s1131_s23 + $0x30] sm:$0xff]   ;;  %v835_v15 = vld [vmem:[%s1131_s23 + $0x38] sm:$0xff]   ;;  %p896_p6 = pnand %p895_p4, %p1074_p12  ;;  %s900_s7 = scalar_lea.vmem %s899_s6, 2048 }
  0x5b   : > { %714 = vmatpush3.bf16.msra.mxu0 %v821_v1  ;;  %752 = vmatpush3.bf16.msra.mxu1 %v821_v1  ;;  %p901_p11 = scmp.lt.s32.totalorder %s1152_s17, %s899_s6  ;;  %p902_p13 = scmp.lt.s32.totalorder %s900_s7, %s894_s28 }
  0x5c   : > { %715 = vmatprep.subr.bf16.mxu0 %v822_v2  ;;  %745 = vmatprep.subr.bf16.mxu1 %v822_v2  ;;  %p897_p8 = pneg %p896_p6 }
  0x5d   : > { %p903_p3 = por %p902_p13, %p901_p11 }
  0x5f   : > { %716 = vmatpush3.bf16.msra.mxu0 %v822_v2  ;;  %753 = vmatpush3.bf16.msra.mxu1 %v822_v2  ;;  %p904_p7 = pnand %p903_p3, %p897_p8 }
  0x60   : > { %717 = vmatprep.subr.bf16.mxu0 %v823_v3  ;;  %746 = vmatprep.subr.bf16.mxu1 %v823_v3 }
  0x63   : > { %718 = vmatpush3.bf16.msra.mxu0 %v823_v3  ;;  %754 = vmatpush3.bf16.msra.mxu1 %v823_v3 }
  0x64   : > { %719 = vmatprep.subr.bf16.mxu0 %v824_v6  ;;  %747 = vmatprep.subr.bf16.mxu1 %v824_v6 }
  0x67   : > { %720 = vmatpush3.bf16.msra.mxu0 %v824_v6  ;;  %755 = vmatpush3.bf16.msra.mxu1 %v824_v6 }
  0x68   : > { %721 = vmatprep.subr.bf16.mxu0 %v825_v7  ;;  %748 = vmatprep.subr.bf16.mxu1 %v825_v7 }
  0x6b   : > { %722 = vmatpush3.bf16.msra.mxu0 %v825_v7  ;;  %756 = vmatpush3.bf16.msra.mxu1 %v825_v7 }
  0x6c   : > { %723 = vmatprep.subr.bf16.mxu0 %v826_v8  ;;  %749 = vmatprep.subr.bf16.mxu1 %v826_v8 }
  0x6f   : > { %724 = vmatpush3.bf16.msra.mxu0 %v826_v8  ;;  %757 = vmatpush3.bf16.msra.mxu1 %v826_v8 }
  0x70   : > { %725 = vmatprep.subr.bf16.mxu0 %v827_v9  ;;  %750 = vmatprep.subr.bf16.mxu1 %v827_v9 }
  0x73   : > { %726 = vmatpush3.bf16.msra.mxu0 %v827_v9  ;;  %758 = vmatpush3.bf16.msra.mxu1 %v827_v9 }
  0x76   : > { %728 = vmatmul.mubr.bf16.vlgmr.msra.gmra.mrb[0].mxu0 %v830_v10  ;;  %736 = vmatmul.mubr.bf16.vlgmr.msra.gmra.mrb[0].mxu1 %v831_v11 }
  0x77   : > { %731 = vmatprep.mubr.bf16.mxu0 %v832_v12  ;;  %739 = vmatprep.mubr.bf16.mxu1 %v833_v13 }
  0x7e   : > { %732 = vmatmul.mubr.bf16.gmra.mrb[4].mxu0 %v834_v14  ;;  %740 = vmatmul.mubr.bf16.gmra.mrb[4].mxu1 %v835_v15 }
 0x149   : > { %v729_v16 = vpop.f32.mrb[0].mxu0  ;;  %v737_v17 = vpop.f32.mrb[0].mxu1 }
 0x14a   : > { %v342_v18 = vpop.f32.mrb[1].mxu0  ;;  %v374_v19 = vpop.f32.mrb[1].mxu1 }
 0x14b   : > { %v730_v20 = vpop.f32.mrb[2].mxu0  ;;  %v738_v21 = vpop.f32.mrb[2].mxu1 }
 0x14c   : > { %v656_v22 = vpack.c.bf16 %v730_v20, %v729_v16  ;;  %v676_v23 = vpack.c.bf16 %v738_v21, %v737_v17  ;;  %v345_v24 = vpop.f32.mrb[3].mxu0  ;;  %v377_v25 = vpop.f32.mrb[3].mxu1 }
 0x14d   : > { %v651_v26 = vpack.c.bf16 %v345_v24, %v342_v18  ;;  %v671_v27 = vpack.c.bf16 %v377_v25, %v374_v19 }
 0x14e   : > { %688 = vst [vmem:[%s176_s15 + $0x8] sm:$0xff] %v656_v22   ;;  %692 = vst [vmem:[%s176_s15 + $0x28] sm:$0xff] %v676_v23  }
 0x14f   : > { %652 = vst [vmem:[%s176_s15] sm:$0xff] %v651_v26   ;;  %691 = vst [vmem:[%s176_s15 + $0x20] sm:$0xff] %v671_v27  }
 0x151   : > { %v733_v28 = vpop.f32.mrb[4].mxu0  ;;  %v741_v29 = vpop.f32.mrb[4].mxu1 }
 0x152   : > { %v358_v30 = vpop.f32.mrb[5].mxu0  ;;  %v390_v31 = vpop.f32.mrb[5].mxu1 }
 0x153   : > { %v734_v32 = vpop.f32.mrb[6].mxu0  ;;  %v742_v33 = vpop.f32.mrb[6].mxu1 }
 0x154   : > { %v666_v34 = vpack.c.bf16 %v734_v32, %v733_v28  ;;  %v686_v35 = vpack.c.bf16 %v742_v33, %v741_v29  ;;  %v361_v36 = vpop.f32.mrb[7].mxu0  ;;  %v393_v37 = vpop.f32.mrb[7].mxu1 }
 0x155   : > { %v661_v38 = vpack.c.bf16 %v361_v36, %v358_v30  ;;  %v681_v39 = vpack.c.bf16 %v393_v37, %v390_v31 }
 0x156   : > { %690 = vst [vmem:[%s176_s15 + $0x18] sm:$0xff] %v666_v34   ;;  %694 = vst [vmem:[%s176_s15 + $0x38] sm:$0xff] %v686_v35  }
 0x157   : > { %689 = vst [vmem:[%s176_s15 + $0x10] sm:$0xff] %v661_v38   ;;  %693 = vst [vmem:[%s176_s15 + $0x30] sm:$0xff] %v681_v39  }
 0x158   : > { %907 = shalt.err (!%p904_p7)
}
 0x159   : > { %s908_s20 = scalar_lea.hbm %s1157_s22, 1024  ;;  %s912_s25 = scalar_lea.hbm %s1202_s2, 3072 }
 0x15a   : > { %p909_p9 = scmp.ne.s32.totalorder %s1157_s22, %s908_s20  ;;  %p913_p5 = scmp.lt.u32.totalorder %s1157_s22, %s1202_s2 }
 0x15b   : > { %p914_p10 = scmp.lt.u32.totalorder %s912_s25, %s908_s20  ;;  %p916_p4 = scmp.lt.u32.totalorder %s908_s20, %s1157_s22 }
 0x15c   : > { %p910_p1 = pnand %p909_p9, %p1074_p12 }
 0x15d   : > { %p915_p2 = por %p914_p10, %p913_p5 }
 0x15e   : > { %p911_p0 = pneg %p910_p1 }
 0x15f   : > { %p917_p6 = por %p916_p4, %p915_p2 }
 0x161   : > { %p918_p8 = pnand %p917_p6, %p911_p0 }
 0x163   : > { %921 = shalt.err (!%p918_p8)
}
 0x164   : > { %s971_s30 = smov 64   ;;  %s972_s23 = smov 4  }
 0x165   : > { %765 = dma.vmem_to_hbm [thread:$0]  (%p1074_p12), %s1152_s17, 1024, %s1157_s22, %s486_s13, %s971_s30, %s971_s30, %s972_s23  }
 0x166 PF: > { %p782_p11 = scmp.ge.s32.totalorder %s964_s12, 2  ;;  %s514_s15 = sand.u32 1, %s952_s9  }
 0x167   : > { %p1217_p13 = scmp.ne.s32.totalorder %s1207_s16, 0  ;;  %s515_s4 = scalar_lea.sflag [#allocation4], %s514_s15 }
 0x169   : > { %p776_p3 = pnand %p782_p11, %p1217_p13 }
 0x16b   : > { %947 = dma.done.wait (!%p776_p3), %s515_s4, 1024  }
 0x16c   : > { %949 = vsyncadd (!%p776_p3), %s515_s4, 4294966272  ;;  %p16_p7 = scmp.ge.s32.totalorder %s1041_s21, 5   ;;  %s1218_s9 = smov %s956_s10 }
 0x16d   : > { %s1219_s10 = smov %s960_s11  ;;  %s1220_s11 = smov %s1070_s8 }
 0x16e   : > { %s1221_s12 = smov %s1041_s21  ;;  %18 = sbr.rel (!%p16_p7) target bundleno = 6 (0x6), region = 77 }
 0x175   :  { %520 = vsyncpa [#allocation3], 1 }
 0x176   :  { %522 = vsyncpa [#allocation3 + $0x1], 1 }
 0x177   :  { %523 = vsyncpa [#allocation6], 1 }
 0x178   :  { %524 = vsyncpa [#allocation4], 1 }
 0x179   :  { %526 = vsyncpa [#allocation4 + $0x1], 1 }

</bundles_post_ra>
